<compile_context>
chip_gen: v6e
topology: v6e:2x2x1
jax: 0.10.0
libtpu: 0.0.40
codegen_flags: <defaults>
</compile_context>

<pallas_src>
import functools

import jax
import jax.numpy as jnp
from jax import lax
from jax.experimental import pallas as pl
from jax.experimental.pallas import tpu as pltpu

BN_EPS = 1e-5
LANE = 128
# Conservative budget for the double-buffered x stream so the kernel fits the
# default scoped-VMEM limit on every generation (v5e 16 MiB, v6e 32 MiB,
# v7x 32 of 64 MiB physical) without raising vmem_limit_bytes.  Weights, biases
# and the (1, tile_b) output block are tiny (<200 KiB) on top of this.
_X_STREAM_VMEM_BUDGET = 12 * 1024 * 1024


def _round_up(n, m):
    return ((n + m - 1) // m) * m


def _mlp_kernel(x_ref, w1_ref, b1_ref, w2_ref, b2_ref, w3_ref, b3_ref, o_ref):
    x = x_ref[...]                     # (TILE_B, in_dim)  bf16 (or f32)
    w1 = w1_ref[...]
    w2 = w2_ref[...]
    w3 = w3_ref[...]
    mm_dtype = w1.dtype                # matmul operand dtype (bf16 or f32)

    # ---- Linear 1 (eval-mode BatchNorm folded into w1/b1) -> ReLU ----------
    # Dropout = identity in eval mode.  Accumulate in f32 on the MXU; keep the
    # elementwise bias/ReLU math in f32 (v5e VPU has no bf16).
    h1 = jnp.dot(x, w1, preferred_element_type=jnp.float32) + b1_ref[...]
    h1 = jnp.maximum(h1, 0.0)

    # ---- Linear 2 -> ReLU ---------------------------------------------------
    # H2 is zero-padded to a multiple of 128 so h2 is lane-dense.
    h2 = jnp.dot(h1.astype(mm_dtype), w2,
                 preferred_element_type=jnp.float32) + b2_ref[...]
    h2 = jnp.maximum(h2, 0.0)

    # ---- Linear 3, transposed: (1, H2p) . (TILE_B, H2p)^T -> (1, TILE_B) ----
    # Batch stays on the lane axis => full (unmasked) vst on the output store
    # and no N=1 matmul that would waste MXU output width.
    # TODO(synk): verify with pl.lower_as_mlir that this trans-B dot_general
    # lowers without a per-step XLU transpose of h2 (H2 padded to 128 keeps any
    # relayout cheap if it does).
    h3 = lax.dot_general(w3, h2.astype(mm_dtype),
                         (((1,), (1,)), ((), ())),
                         preferred_element_type=jnp.float32) + b3_ref[...]

    # ---- Sigmoid ------------------------------------------------------------
    o_ref[...] = jax.nn.sigmoid(h3)


def prepare_params(params, *, dtype=jnp.bfloat16):
    """One-time parameter prep (do NOT call per forward):
      - fold eval-mode BatchNorm1d (running stats + affine) into Linear-1,
      - transpose Linear weights from PyTorch [out, in] to [in, out],
      - zero-pad H2 (= hidden_dim // 2) to a multiple of 128 (lane-dense h2),
      - reshape biases to [1, features] rows (kept f32),
      - cast matmul weights to `dtype` (bf16 default: halves HBM traffic and
        matches the native MXU dtype on v5e/v6e/v7x)."""
    f32 = jnp.float32
    scale = params["bn_gamma"].astype(f32) * lax.rsqrt(
        params["bn_var"].astype(f32) + BN_EPS)                               # [H]
    w1 = params["w1"].astype(f32).T * scale[None, :]                         # [in, H]
    b1 = (params["b1"].astype(f32) - params["bn_mean"].astype(f32)) * scale \
        + params["bn_beta"].astype(f32)                                      # [H]

    w2 = params["w2"].astype(f32).T                                          # [H, H2]
    b2 = params["b2"].astype(f32)                                            # [H2]
    w3 = params["w3"].astype(f32)                                            # [1, H2]
    b3 = params["b3"].astype(f32)                                            # [1]

    # Zero-pad H2 up to a lane-dense multiple of 128. Padded channels stay
    # exactly 0 through bias+ReLU and contribute nothing to the final dot.
    h2 = w2.shape[1]
    h2p = _round_up(h2, LANE)
    if h2p != h2:
        w2 = jnp.pad(w2, ((0, 0), (0, h2p - h2)))
        b2 = jnp.pad(b2, ((0, h2p - h2),))
        w3 = jnp.pad(w3, ((0, 0), (0, h2p - h2)))

    return {
        "w1": w1.astype(dtype),              # [in, H]
        "b1": b1[None, :],                   # [1, H]    f32
        "w2": w2.astype(dtype),              # [H, H2p]
        "b2": b2[None, :],                   # [1, H2p]  f32
        "w3": w3.astype(dtype),              # [1, H2p]
        "b3": b3[None, :],                   # [1, 1]    f32
    }


@functools.partial(jax.jit, static_argnames=("tile_b",))
def mlp_predictor(x, prepped, *, tile_b=8192):
    """x: [B, input_dim] float32, prepped = prepare_params(params).
    Returns [B] float32 (sigmoid probabilities)."""
    B, in_dim = x.shape
    w1, b1 = prepped["w1"], prepped["b1"]
    w2, b2 = prepped["w2"], prepped["b2"]
    w3, b3 = prepped["w3"], prepped["b3"]
    hidden, h2p = w2.shape

    mm_dtype = w1.dtype
    x = x.astype(mm_dtype)               # cast the streamed operand once (bf16 path)

    # Pad the batch only to the 128-lane boundary (NOT to tile_b): the grid uses
    # cdiv and Pallas handles the ragged last block, so padding waste < 128 rows.
    b_pad = _round_up(B, LANE)
    if b_pad != B:
        x = jnp.pad(x, ((0, b_pad - B), (0, 0)))

    # ---- tile_b selection (all static under jit) ----------------------------
    # Must be a multiple of 128: the (1, tile_b) output block puts the batch on
    # the lane axis (full vst, no masked partial stores).
    tile_b = max(LANE, _round_up(int(tile_b), LANE))
    # VMEM cap: double-buffered x stream must fit the conservative budget.
    bytes_per_row = in_dim * jnp.dtype(mm_dtype).itemsize
    vmem_cap = max(LANE, (_X_STREAM_VMEM_BUDGET // (2 * bytes_per_row)) // LANE * LANE)
    # v7x cap: keep >=2 grid tiles whenever b_pad allows so the "parallel" batch
    # axis actually shards across both TensorCores (harmless on v5e/v6e).
    two_tile_cap = max(LANE, _round_up(pl.cdiv(b_pad, 2), LANE))
    tile_b = min(tile_b, vmem_cap, two_tile_cap, b_pad)

    num_tiles = pl.cdiv(b_pad, tile_b)

    # Advisory cost estimate so XLA can schedule/overlap this short kernel.
    flops = 2 * b_pad * (in_dim * hidden + hidden * h2p + h2p)
    bytes_accessed = (
        b_pad * in_dim * jnp.dtype(mm_dtype).itemsize    # x stream
        + b_pad * 4                                      # output
        + sum(int(a.size) * a.dtype.itemsize for a in (w1, b1, w2, b2, w3, b3)))
    cost = pl.CostEstimate(flops=int(flops), transcendentals=int(b_pad),
                           bytes_accessed=int(bytes_accessed))

    res = lambda i: (0, 0)   # weights/biases: same block every step -> VMEM-resident
    in_specs = [
        pl.BlockSpec((tile_b, in_dim), lambda i: (i, 0)),   # x streamed over batch
        pl.BlockSpec(w1.shape, res),
        pl.BlockSpec(b1.shape, res),
        pl.BlockSpec(w2.shape, res),
        pl.BlockSpec(b2.shape, res),
        pl.BlockSpec(w3.shape, res),
        pl.BlockSpec(b3.shape, res),
    ]

    out = pl.pallas_call(
        _mlp_kernel,
        out_shape=jax.ShapeDtypeStruct((1, b_pad), jnp.float32),
        grid=(num_tiles,),
        in_specs=in_specs,
        out_specs=pl.BlockSpec((1, tile_b), lambda i: (0, i)),  # lane-dense output
        compiler_params=pltpu.CompilerParams(
            dimension_semantics=("parallel",)),  # shard batch tiles across TCs (v7x)
        cost_estimate=cost,
    )(x, w1, b1, w2, b2, w3, b3)

    return out[0, :B]  # drop padding + squeeze(-1)


def init_params(key, input_dim, hidden_dim=128):
    h2 = hidden_dim // 2
    ks = jax.random.split(key, 6)

    def linear_init(kw, kb, fan_in, fan_out):
        bound = 1.0 / jnp.sqrt(fan_in)
        w = jax.random.uniform(kw, (fan_out, fan_in), jnp.float32, -bound, bound)
        b = jax.random.uniform(kb, (fan_out,), jnp.float32, -bound, bound)
        return w, b

    w1, b1 = linear_init(ks[0], ks[1], input_dim, hidden_dim)
    w2, b2 = linear_init(ks[2], ks[3], hidden_dim, h2)
    w3, b3 = linear_init(ks[4], ks[5], h2, 1)
    return {
        "w1": w1, "b1": b1,
        "w2": w2, "b2": b2,
        "w3": w3, "b3": b3,
        "bn_gamma": jnp.ones((hidden_dim,), jnp.float32),
        "bn_beta": jnp.zeros((hidden_dim,), jnp.float32),
        "bn_mean": jnp.zeros((hidden_dim,), jnp.float32),
        "bn_var": jnp.ones((hidden_dim,), jnp.float32),
    }


def _reference(x, params):
    """Plain-JAX f32 reference of the same (eval-mode) forward pass."""
    h = x @ params["w1"].T + params["b1"]
    h = (h - params["bn_mean"]) / jnp.sqrt(params["bn_var"] + BN_EPS)
    h = h * params["bn_gamma"] + params["bn_beta"]
    h = jnp.maximum(h, 0.0)
    h = jnp.maximum(h @ params["w2"].T + params["b2"], 0.0)
    h = h @ params["w3"].T + params["b3"]
    return jax.nn.sigmoid(h)[:, 0]


if __name__ == "__main__":
    key = jax.random.PRNGKey(0)
    k_x, k_p, k_bn, k_x2 = jax.random.split(key, 4)

    B, INPUT_DIM, HIDDEN = 8, 32, 128
    x = jax.random.normal(k_x, (B, INPUT_DIM), jnp.float32)
    params = init_params(k_p, INPUT_DIM, HIDDEN)

    # Non-trivial BN running stats / affine so the BN->Linear-1 fold is exercised.
    kg, kb, km, kv = jax.random.split(k_bn, 4)
    params["bn_gamma"] = 1.0 + 0.1 * jax.random.normal(kg, (HIDDEN,), jnp.float32)
    params["bn_beta"] = 0.1 * jax.random.normal(kb, (HIDDEN,), jnp.float32)
    params["bn_mean"] = 0.1 * jax.random.normal(km, (HIDDEN,), jnp.float32)
    params["bn_var"] = jnp.abs(1.0 + 0.1 * jax.random.normal(kv, (HIDDEN,), jnp.float32))

    ref = _reference(x, params)

    # --- exact f32 path: tight tolerance ------------------------------------
    prepped_f32 = prepare_params(params, dtype=jnp.float32)
    out_f32 = jax.block_until_ready(mlp_predictor(x, prepped_f32))
    assert out_f32.shape == (B,)
    assert jnp.allclose(out_f32, ref, atol=2e-5, rtol=2e-5), (out_f32, ref)

    # --- default bf16 matmul path: relaxed tolerance ------------------------
    prepped_bf16 = prepare_params(params)               # dtype=bf16 (default)
    out_bf16 = jax.block_until_ready(mlp_predictor(x, prepped_bf16))
    assert out_bf16.shape == (B,)
    assert jnp.allclose(out_bf16, ref, atol=2e-2, rtol=2e-2), (out_bf16, ref)

    # --- multi-tile + ragged-last-block path (B=300 -> 2 tiles of 256) ------
    B2 = 300
    x2 = jax.random.normal(k_x2, (B2, INPUT_DIM), jnp.float32)
    ref2 = _reference(x2, params)
    out2 = jax.block_until_ready(mlp_predictor(x2, prepped_bf16))
    assert out2.shape == (B2,)
    assert jnp.allclose(out2, ref2, atol=2e-2, rtol=2e-2), (out2, ref2)

    print("KERNEL_OK")
</pallas_src>

<mosaic_0001>
module attributes {stable_mosaic.version = 11 : i64} {
  func.func @_mlp_kernel(%arg0: i32, %arg1: memref<128x32xf32, #tpu.memory_space<vmem>>, %arg2: memref<32x128xf32, #tpu.memory_space<vmem>>, %arg3: memref<1x128xf32, #tpu.memory_space<vmem>>, %arg4: memref<128x128xf32, #tpu.memory_space<vmem>>, %arg5: memref<1x128xf32, #tpu.memory_space<vmem>>, %arg6: memref<1x128xf32, #tpu.memory_space<vmem>>, %arg7: memref<1x1xf32, #tpu.memory_space<vmem>>, %arg8: memref<1x128xf32, #tpu.memory_space<vmem>>) attributes {dimension_semantics = [#tpu.dimension_semantics<parallel>], iteration_bounds = array<i64: 1>, scalar_prefetch = 0 : i64, scratch_operands = 0 : i64, tpu.core_type = #tpu.core_type<tc>, window_params = [{transform_indices = @transform_0, window_bounds = array<i64: 128, 32>}, {pipeline_mode = #tpu.pipeline_mode<synchronous>, transform_indices = @transform_1, window_bounds = array<i64: 32, 128>}, {pipeline_mode = #tpu.pipeline_mode<synchronous>, transform_indices = @transform_2, window_bounds = array<i64: 1, 128>}, {pipeline_mode = #tpu.pipeline_mode<synchronous>, transform_indices = @transform_3, window_bounds = array<i64: 128, 128>}, {pipeline_mode = #tpu.pipeline_mode<synchronous>, transform_indices = @transform_4, window_bounds = array<i64: 1, 128>}, {pipeline_mode = #tpu.pipeline_mode<synchronous>, transform_indices = @transform_5, window_bounds = array<i64: 1, 128>}, {pipeline_mode = #tpu.pipeline_mode<synchronous>, transform_indices = @transform_6, window_bounds = array<i64: 1, 1>}, {transform_indices = @transform_7, window_bounds = array<i64: 1, 128>}]} {
    %c0 = arith.constant 0 : index
    %c0_0 = arith.constant 0 : index
    %0 = vector.load %arg1[%c0, %c0_0] : memref<128x32xf32, #tpu.memory_space<vmem>>, vector<128x32xf32>
    %c0_1 = arith.constant 0 : index
    %c0_2 = arith.constant 0 : index
    %1 = vector.load %arg2[%c0_1, %c0_2] : memref<32x128xf32, #tpu.memory_space<vmem>>, vector<32x128xf32>
    %c0_3 = arith.constant 0 : index
    %c0_4 = arith.constant 0 : index
    %2 = vector.load %arg4[%c0_3, %c0_4] : memref<128x128xf32, #tpu.memory_space<vmem>>, vector<128x128xf32>
    %c0_5 = arith.constant 0 : index
    %c0_6 = arith.constant 0 : index
    %3 = vector.load %arg6[%c0_5, %c0_6] : memref<1x128xf32, #tpu.memory_space<vmem>>, vector<1x128xf32>
    %cst = arith.constant dense<0.000000e+00> : vector<128x128xf32>
    %4 = tpu.matmul %0, %1, %cst {dimension_numbers = #tpu.dot_dimension_numbers<[1], [0], [0], [1], [0, 0, 1, 1], [], []>} : vector<128x32xf32>, vector<32x128xf32>, vector<128x128xf32> -> vector<128x128xf32>
    %c0_7 = arith.constant 0 : index
    %c0_8 = arith.constant 0 : index
    %5 = vector.load %arg3[%c0_7, %c0_8] : memref<1x128xf32, #tpu.memory_space<vmem>>, vector<1x128xf32>
    %6 = vector.broadcast %5 : vector<1x128xf32> to vector<128x128xf32>
    %7 = arith.addf %4, %6 : vector<128x128xf32>
    %cst_9 = arith.constant 0.000000e+00 : f32
    %8 = vector.broadcast %cst_9 : f32 to vector<128x128xf32>
    %9 = arith.maximumf %7, %8 : vector<128x128xf32>
    %cst_10 = arith.constant dense<0.000000e+00> : vector<128x128xf32>
    %10 = tpu.matmul %9, %2, %cst_10 {dimension_numbers = #tpu.dot_dimension_numbers<[1], [0], [0], [1], [0, 0, 1, 1], [], []>} : vector<128x128xf32>, vector<128x128xf32>, vector<128x128xf32> -> vector<128x128xf32>
    %c0_11 = arith.constant 0 : index
    %c0_12 = arith.constant 0 : index
    %11 = vector.load %arg5[%c0_11, %c0_12] : memref<1x128xf32, #tpu.memory_space<vmem>>, vector<1x128xf32>
    %12 = vector.broadcast %11 : vector<1x128xf32> to vector<128x128xf32>
    %13 = arith.addf %10, %12 : vector<128x128xf32>
    %cst_13 = arith.constant 0.000000e+00 : f32
    %14 = vector.broadcast %cst_13 : f32 to vector<128x128xf32>
    %15 = arith.maximumf %13, %14 : vector<128x128xf32>
    %cst_14 = arith.constant dense<0.000000e+00> : vector<1x128xf32>
    %16 = tpu.matmul %3, %15, %cst_14 {dimension_numbers = #tpu.dot_dimension_numbers<[1], [1], [0], [0], [0, 0, 1, 0], [], []>} : vector<1x128xf32>, vector<128x128xf32>, vector<1x128xf32> -> vector<1x128xf32>
    %c0_15 = arith.constant 0 : index
    %c0_16 = arith.constant 0 : index
    %17 = vector.load %arg7[%c0_15, %c0_16] : memref<1x1xf32, #tpu.memory_space<vmem>>, vector<1x1xf32>
    %18 = vector.broadcast %17 : vector<1x1xf32> to vector<1x128xf32>
    %19 = arith.addf %16, %18 : vector<1x128xf32>
    %20 = arith.negf %19 : vector<1x128xf32>
    %21 = math.exp %20 : vector<1x128xf32>
    %cst_17 = arith.constant 1.000000e+00 : f32
    %22 = vector.broadcast %cst_17 : f32 to vector<1x128xf32>
    %23 = arith.addf %22, %21 : vector<1x128xf32>
    %24 = arith.divf %22, %23 : vector<1x128xf32>
    %c0_18 = arith.constant 0 : index
    %c0_19 = arith.constant 0 : index
    %25 = vector.load %arg8[%c0_18, %c0_19] : memref<1x128xf32, #tpu.memory_space<vmem>>, vector<1x128xf32>
    tpu.vector_store %arg8[%c0_18, %c0_19], %24 {strides = array<i32>} : memref<1x128xf32, #tpu.memory_space<vmem>>, vector<1x128xf32>,
    return
  }
  func.func @transform_0(%arg0: i32) -> (i32, i32) {
    %c0_i32 = arith.constant 0 : i32
    %c0_i32_0 = arith.constant 0 : i32
    return %arg0, %c0_i32 : i32, i32
  }
  func.func @transform_1(%arg0: i32) -> (i32, i32) {
    %c0_i32 = arith.constant 0 : i32
    %c0_i32_0 = arith.constant 0 : i32
    %c0_i32_1 = arith.constant 0 : i32
    return %c0_i32, %c0_i32_0 : i32, i32
  }
  func.func @transform_2(%arg0: i32) -> (i32, i32) {
    %c0_i32 = arith.constant 0 : i32
    %c0_i32_0 = arith.constant 0 : i32
    %c0_i32_1 = arith.constant 0 : i32
    return %c0_i32, %c0_i32_0 : i32, i32
  }
  func.func @transform_3(%arg0: i32) -> (i32, i32) {
    %c0_i32 = arith.constant 0 : i32
    %c0_i32_0 = arith.constant 0 : i32
    %c0_i32_1 = arith.constant 0 : i32
    return %c0_i32, %c0_i32_0 : i32, i32
  }
  func.func @transform_4(%arg0: i32) -> (i32, i32) {
    %c0_i32 = arith.constant 0 : i32
    %c0_i32_0 = arith.constant 0 : i32
    %c0_i32_1 = arith.constant 0 : i32
    return %c0_i32, %c0_i32_0 : i32, i32
  }
  func.func @transform_5(%arg0: i32) -> (i32, i32) {
    %c0_i32 = arith.constant 0 : i32
    %c0_i32_0 = arith.constant 0 : i32
    %c0_i32_1 = arith.constant 0 : i32
    return %c0_i32, %c0_i32_0 : i32, i32
  }
  func.func @transform_6(%arg0: i32) -> (i32, i32) {
    %c0_i32 = arith.constant 0 : i32
    %c0_i32_0 = arith.constant 0 : i32
    %c0_i32_1 = arith.constant 0 : i32
    return %c0_i32, %c0_i32_0 : i32, i32
  }
  func.func @transform_7(%arg0: i32) -> (i32, i32) {
    %c0_i32 = arith.constant 0 : i32
    %c0_i32_0 = arith.constant 0 : i32
    return %c0_i32, %arg0 : i32, i32
  }
}

</mosaic_0001>

<bundles_post_ra>
// kernel: mlp_predictor.1
= control target key start
LH: loop header
LB: loop body
LE: loop exit
PB: predicated region body
PF: predicated region fallthrough
CT: control target
= control target key end

     0   :  { %s1002_s0 = inlined_call_operand.vmem [shape: f32[128,32], index: 0, kind: input, shape index: {}]   ;;  %s1003_s1 = inlined_call_operand.hbm [shape: f32[32,128], index: 1, kind: input, shape index: {}]   ;;  %s1004_s2 = inlined_call_operand.vmem [shape: f32[1,128], index: 2, kind: input, shape index: {}]   ;;  %s1005_s3 = inlined_call_operand.vmem [shape: f32[128,128], index: 3, kind: input, shape index: {}]   ;;  %s1006_s4 = inlined_call_operand.vmem [shape: f32[1,128], index: 4, kind: input, shape index: {}]   ;;  %s1007_s5 = inlined_call_operand.vmem [shape: f32[1,128], index: 5, kind: input, shape index: {}]   ;;  %s1008_s6 = inlined_call_operand.<no memory space> [shape: f32[1,1], index: 6, kind: input, shape index: {}]   ;;  %s1009_s7 = inlined_call_operand.vmem [shape: f32[1,128], index: 7, kind: output, shape index: {}]  }
   0x1   :  { %v12_v0 = vstv %s1008_s6 }
   0x2   :  { %13 = vst [vmem:[#allocation2] sm:$0x1] %v12_v0 }
   0x3   :  { %14 = vsyncpa [#allocation4], 0  ;;  %s800_s26 = smov [#allocation3]  }
   0x4   :  { %s22_s27 = sshll.u32 %s800_s26, 4  ;;  %s23_s27 = int_to_ptr.vmem [resolvable:$true] %s22_s27 }
   0x5   :  { %s786_s28 = scalar_lea.vmem %s23_s27, 512  ;;  %p791_p1 = scmp.lt.s32.totalorder %s23_s27, %s23_s27 }
   0x6   :  { %p787_p0 = scmp.ne.s32.totalorder %s23_s27, %s786_s28  ;;  %p792_p2 = scmp.lt.s32.totalorder %s786_s28, %s786_s28 }
   0x8   :  { %p793_p3 = por %p792_p2, %p791_p1 }
   0xa   :  { %p794_p4 = pnand %p793_p3, %p787_p0 }
   0xc   :  { %797 = shalt.err (!%p794_p4)
}
   0xd   :  { %s801_s29 = smov 128   ;;  %s802_s30 = smov 8  }
   0xe   :  { %28 = dma.hbm_to_vmem [thread:$0]  %s1003_s1, 512, %s23_s27, [#allocation4], %s801_s29, %s801_s29, %s802_s30  }
   0xf   :  { %798 = dma.done.wait [#allocation4], 512  }
  0x10   :  { %799 = vsyncadd [#allocation4], 4294966784  ;;  %vm86_vm0 = vcmask 261120   ;;  %v61_v1 = vld [vmem:[#allocation3 + $0x18] sm:$0xff]  ;;  %v60_v2 = vld [vmem:[#allocation3 + $0x10] sm:$0xff]  ;;  %vm804_vm1 = vmmov 0  }
  0x11   :  { %644 = vmatprep.subr.mxu1 %v61_v1  ;;  %v42_v3 = vld [vmem:[%s1002_s0] sm:$0xff]  ;;  %v59_v4 = vld [vmem:[#allocation3 + $0x8] sm:$0xff]  ;;  %v77_v7 = vld [vmem:[%s1005_s3 + $0x78] sm:$0xff] }
  0x12   :  { %645 = vmatpush3.msra.mxu1 %v61_v1  ;;  %652 = vmatprep.mubr.msk.f32.mxu1 %vm86_vm0, %v42_v3  ;;  %v58_v5 = vld [vmem:[#allocation3] sm:$0xff]  ;;  %v44_v8 = vld [vmem:[%s1002_s0 + $0x10] sm:$0xff]  ;;  %v45_v10 = vld [vmem:[%s1002_s0 + $0x18] sm:$0xff] }
  0x13   :  { %646 = vmatprep.subr.mxu1 %v60_v2  ;;  %v43_v6 = vld [vmem:[%s1002_s0 + $0x8] sm:$0xff]  ;;  %v76_v9 = vld [vmem:[%s1005_s3 + $0x70] sm:$0xff]  ;;  %v46_v12 = vld [vmem:[%s1002_s0 + $0x20] sm:$0xff] }
  0x14   :  { %647 = vmatpush3.msra.mxu1 %v60_v2  ;;  %v75_v11 = vld [vmem:[%s1005_s3 + $0x68] sm:$0xff]  ;;  %v74_v13 = vld [vmem:[%s1005_s3 + $0x60] sm:$0xff]  ;;  %v73_v15 = vld [vmem:[%s1005_s3 + $0x58] sm:$0xff] }
  0x15   :  { %648 = vmatprep.subr.mxu1 %v59_v4  ;;  %v47_v14 = vld [vmem:[%s1002_s0 + $0x28] sm:$0xff]  ;;  %v48_v16 = vld [vmem:[%s1002_s0 + $0x30] sm:$0xff]  ;;  %v49_v18 = vld [vmem:[%s1002_s0 + $0x38] sm:$0xff] }
  0x16   :  { %649 = vmatpush3.msra.mxu1 %v59_v4  ;;  %v72_v17 = vld [vmem:[%s1005_s3 + $0x50] sm:$0xff]  ;;  %v71_v19 = vld [vmem:[%s1005_s3 + $0x48] sm:$0xff]  ;;  %v50_v20 = vld [vmem:[%s1002_s0 + $0x40] sm:$0xff] }
  0x17   :  { %650 = vmatprep.subr.mxu1 %v58_v5  ;;  %v70_v21 = vld [vmem:[%s1005_s3 + $0x40] sm:$0xff]  ;;  %v51_v22 = vld [vmem:[%s1002_s0 + $0x48] sm:$0xff]  ;;  %v69_v23 = vld [vmem:[%s1005_s3 + $0x38] sm:$0xff] }
  0x18   :  { %651 = vmatpush3.msra.mxu1 %v58_v5  ;;  %v52_v24 = vld [vmem:[%s1002_s0 + $0x50] sm:$0xff]  ;;  %v53_v26 = vld [vmem:[%s1002_s0 + $0x58] sm:$0xff]  ;;  %v67_v27 = vld [vmem:[%s1005_s3 + $0x28] sm:$0xff] }
  0x19   :  { %653 = vmatmul.mubr.msk.f32.vlgmr.msra.gmra.mxu1 %vm86_vm0, %v43_v6  ;;  %676 = vmatprep.subr.mxu1 %v77_v7  ;;  %v68_v25 = vld [vmem:[%s1005_s3 + $0x30] sm:$0xff]  ;;  %v54_v28 = vld [vmem:[%s1002_s0 + $0x60] sm:$0xff]  ;;  %v55_v30 = vld [vmem:[%s1002_s0 + $0x68] sm:$0xff] }
  0x1a   :  { %655 = vmatprep.mubr.msk.f32.mxu1 %vm86_vm0, %v44_v8  ;;  %677 = vmatpush3.msra.mxu1 %v77_v7  ;;  %v66_v29 = vld [vmem:[%s1005_s3 + $0x20] sm:$0xff]  ;;  %v65_v31 = vld [vmem:[%s1005_s3 + $0x18] sm:$0xff]  ;;  %v56_v32 = vld [vmem:[%s1002_s0 + $0x70] sm:$0xff] }
  0x1b   :  { %678 = vmatprep.subr.mxu1 %v76_v9  ;;  %v57_v33 = vld [vmem:[%s1002_s0 + $0x78] sm:$0xff]  ;;  %v64_v34 = vld [vmem:[%s1005_s3 + $0x10] sm:$0xff]  ;;  %v63_v35 = vld [vmem:[%s1005_s3 + $0x8] sm:$0xff] }
  0x1c   :  { %679 = vmatpush3.msra.mxu1 %v76_v9  ;;  %v62_v36 = vld [vmem:[%s1005_s3] sm:$0xff] }
  0x1d   :  { %656 = vmatmul.mubr.msk.f32.gmra.mxu1 %vm86_vm0, %v45_v10  ;;  %680 = vmatprep.subr.mxu1 %v75_v11  ;;  %v556_v37 = vld [vmem:[%s1004_s2] ss:$0 sm:$0xff] }
  0x1e   :  { %658 = vmatprep.mubr.msk.f32.mxu1 %vm86_vm0, %v46_v12  ;;  %681 = vmatpush3.msra.mxu1 %v75_v11 }
  0x1f   :  { %682 = vmatprep.subr.mxu1 %v74_v13 }
  0x20   :  { %683 = vmatpush3.msra.mxu1 %v74_v13 }
  0x21   :  { %659 = vmatmul.mubr.msk.f32.gmra.mxu1 %vm86_vm0, %v47_v14  ;;  %684 = vmatprep.subr.mxu1 %v73_v15 }
  0x22   :  { %661 = vmatprep.mubr.msk.f32.mxu1 %vm86_vm0, %v48_v16  ;;  %685 = vmatpush3.msra.mxu1 %v73_v15 }
  0x23   :  { %686 = vmatprep.subr.mxu1 %v72_v17 }
  0x24   :  { %687 = vmatpush3.msra.mxu1 %v72_v17 }
  0x25   :  { %662 = vmatmul.mubr.msk.f32.gmra.mxu1 %vm86_vm0, %v49_v18  ;;  %688 = vmatprep.subr.mxu1 %v71_v19 }
  0x26   :  { %664 = vmatprep.mubr.msk.f32.mxu1 %vm86_vm0, %v50_v20  ;;  %689 = vmatpush3.msra.mxu1 %v71_v19 }
  0x27   :  { %690 = vmatprep.subr.mxu1 %v70_v21 }
  0x28   :  { %691 = vmatpush3.msra.mxu1 %v70_v21 }
  0x29   :  { %665 = vmatmul.mubr.msk.f32.gmra.mxu1 %vm86_vm0, %v51_v22  ;;  %692 = vmatprep.subr.mxu1 %v69_v23  ;;  %v803_v22 = vmov 0.0  }
  0x2a   :  { %667 = vmatprep.mubr.msk.f32.mxu1 %vm86_vm0, %v52_v24  ;;  %693 = vmatpush3.msra.mxu1 %v69_v23  ;;  %v464_v23 = vld [vmem:[#allocation2] sm:$0x1]  ;;  %v805_v24 = vmov 0  }
  0x2b   :  { %694 = vmatprep.subr.mxu1 %v68_v25  ;;  %732 = vmatprep.subr.mxu0 %v803_v22 }
  0x2c   :  { %695 = vmatpush3.msra.mxu1 %v68_v25  ;;  %764 = vmatprep.mubr.msk.f32.mxu0 %vm804_vm1, %v803_v22 }
  0x2d   :  { %668 = vmatmul.mubr.msk.f32.gmra.mxu1 %vm86_vm0, %v53_v26  ;;  %696 = vmatprep.subr.mxu1 %v67_v27 }
  0x2e   :  { %670 = vmatprep.mubr.msk.f32.mxu1 %vm86_vm0, %v54_v28  ;;  %697 = vmatpush3.msra.mxu1 %v67_v27 }
  0x2f   :  { %698 = vmatprep.subr.mxu1 %v66_v29  ;;  %773 = vset.pattern.permute.xlu0 %v805_v24 }
  0x30   :  { %699 = vmatpush3.msra.mxu1 %v66_v29  ;;  %467 = vperm.xlu0 %773, %v464_v23  }
  0x31   :  { %671 = vmatmul.mubr.msk.f32.gmra.mxu1 %vm86_vm0, %v55_v30  ;;  %700 = vmatprep.subr.mxu1 %v65_v31 }
  0x32   :  { %673 = vmatprep.mubr.msk.f32.mxu1 %vm86_vm0, %v56_v32  ;;  %701 = vmatpush3.msra.mxu1 %v65_v31 }
  0x33   :  { %702 = vmatprep.subr.mxu1 %v64_v34 }
  0x34   :  { %703 = vmatpush3.msra.mxu1 %v64_v34 }
  0x35   :  { %674 = vmatmul.mubr.msk.f32.gmra.mxu1 %vm86_vm0, %v57_v33  ;;  %704 = vmatprep.subr.mxu1 %v63_v35 }
  0x36   :  { %705 = vmatpush3.msra.mxu1 %v63_v35 }
  0x37   :  { %706 = vmatprep.subr.mxu1 %v62_v36 }
  0x38   :  { %707 = vmatpush3.msra.mxu1 %v62_v36 }
  0xd9   :  { %v654_v38 = vpop.f32.mrf.mxu1 }
  0xda   :  { %v207_v39 = vadd.f32 %v654_v38, %v556_v37 }
  0xdb   :  { %v201_v40 = vpop.f32.mrf.mxu1 }
  0xdc   :  { %v202_v41 = vadd.f32 %v556_v37, %v201_v40  ;;  %v281_v44 = vmax.f32 %v207_v39, 0.0  ;;  %v573_v39 = vld [vmem:[%s1006_s4] ss:$0 sm:$0xff] }
  0xdd   :  { %v657_v42 = vpop.f32.mrf.mxu1 }
  0xde   :  { %v280_v43 = vmax.f32 %v202_v41, 0.0  ;;  %v217_v45 = vadd.f32 %v657_v42, %v556_v37 }
  0xdf   :  { %v211_v46 = vpop.f32.mrf.mxu1 }
  0xe0   :  { %v212_v47 = vadd.f32 %v556_v37, %v211_v46  ;;  %708 = vmatprep.mubr.f32.mxu1 %v280_v43  ;;  %v283_v50 = vmax.f32 %v217_v45, 0.0 }
  0xe1   :  { %v660_v48 = vpop.f32.mrf.mxu1  ;;  %709 = vmatmul.mubr.f32.vlgmr.msra.gmra.mxu1 %v281_v44 }
  0xe2   :  { %v282_v49 = vmax.f32 %v212_v47, 0.0  ;;  %v227_v51 = vadd.f32 %v660_v48, %v556_v37 }
  0xe3   :  { %v221_v52 = vpop.f32.mrf.mxu1 }
  0xe4   :  { %v222_v53 = vadd.f32 %v556_v37, %v221_v52  ;;  %711 = vmatprep.mubr.f32.mxu1 %v282_v49  ;;  %v285_v56 = vmax.f32 %v227_v51, 0.0 }
  0xe5   :  { %v663_v54 = vpop.f32.mrf.mxu1  ;;  %712 = vmatmul.mubr.f32.gmra.mxu1 %v283_v50 }
  0xe6   :  { %v284_v55 = vmax.f32 %v222_v53, 0.0  ;;  %v237_v57 = vadd.f32 %v663_v54, %v556_v37 }
  0xe7   :  { %v231_v58 = vpop.f32.mrf.mxu1 }
  0xe8   :  { %v232_v59 = vadd.f32 %v556_v37, %v231_v58  ;;  %714 = vmatprep.mubr.f32.mxu1 %v284_v55  ;;  %v287_v62 = vmax.f32 %v237_v57, 0.0 }
  0xe9   :  { %v666_v60 = vpop.f32.mrf.mxu1  ;;  %715 = vmatmul.mubr.f32.gmra.mxu1 %v285_v56 }
  0xea   :  { %v286_v61 = vmax.f32 %v232_v59, 0.0  ;;  %v247_v63 = vadd.f32 %v666_v60, %v556_v37 }
  0xeb   :  { %v241_v0 = vpop.f32.mrf.mxu1 }
  0xec   :  { %v242_v1 = vadd.f32 %v556_v37, %v241_v0  ;;  %717 = vmatprep.mubr.f32.mxu1 %v286_v61  ;;  %v289_v4 = vmax.f32 %v247_v63, 0.0 }
  0xed   :  { %v669_v2 = vpop.f32.mrf.mxu1  ;;  %718 = vmatmul.mubr.f32.gmra.mxu1 %v287_v62 }
  0xee   :  { %v288_v3 = vmax.f32 %v242_v1, 0.0  ;;  %v257_v5 = vadd.f32 %v669_v2, %v556_v37 }
  0xef   :  { %v251_v6 = vpop.f32.mrf.mxu1 }
  0xf0   :  { %v252_v7 = vadd.f32 %v556_v37, %v251_v6  ;;  %720 = vmatprep.mubr.f32.mxu1 %v288_v3  ;;  %v291_v10 = vmax.f32 %v257_v5, 0.0 }
  0xf1   :  { %v672_v8 = vpop.f32.mrf.mxu1  ;;  %721 = vmatmul.mubr.f32.gmra.mxu1 %v289_v4 }
  0xf2   :  { %v290_v9 = vmax.f32 %v252_v7, 0.0  ;;  %v267_v11 = vadd.f32 %v672_v8, %v556_v37 }
  0xf3   :  { %v261_v12 = vpop.f32.mrf.mxu1 }
  0xf4   :  { %v262_v13 = vadd.f32 %v556_v37, %v261_v12  ;;  %723 = vmatprep.mubr.f32.mxu1 %v290_v9  ;;  %v293_v16 = vmax.f32 %v267_v11, 0.0  ;;  %v470_v11 = vlaneseq }
  0xf5   :  { %v675_v14 = vpop.f32.mrf.mxu1  ;;  %724 = vmatmul.mubr.f32.gmra.mxu1 %v291_v10  ;;  %v78_v10 = vld [vmem:[%s1007_s5] sm:$0x1] }
  0xf6   :  { %v292_v15 = vmax.f32 %v262_v13, 0.0  ;;  %v277_v17 = vadd.f32 %v675_v14, %v556_v37  ;;  %v471_v12 = vshrl.u32 %v470_v11, 7  ;;  %v468_v14 = vpop.permute.xlu0 %467 }
  0xf7   :  { %v271_v18 = vpop.f32.mrf.mxu1 }
  0xf8   :  { %v272_v19 = vadd.f32 %v556_v37, %v271_v18  ;;  %726 = vmatprep.mubr.f32.mxu1 %v292_v15  ;;  %v295_v21 = vmax.f32 %v277_v17, 0.0  ;;  %v472_v13 = vsub.s32 0, %v471_v12 }
  0xf9   :  { %727 = vmatmul.mubr.f32.gmra.mxu1 %v293_v16 }
  0xfa   :  { %v294_v20 = vmax.f32 %v272_v19, 0.0  ;;  %v473_v15 = vrot.slane %v468_v14, %v472_v13 }
  0xfc   :  { %729 = vmatprep.mubr.f32.mxu1 %v294_v20 }
  0xfd   :  { %730 = vmatmul.mubr.f32.gmra.mxu1 %v295_v21 }
 0x1a1   :  { %v969_v25 = vpop.f32.mrf.mxu1 }
 0x1a2   :  { %v375_v5 = vadd.f32 %v969_v25, %v573_v39 }
 0x1a3   :  { %v971_v26 = vpop.f32.mrf.mxu1 }
 0x1a4   :  { %v449_v7 = vmax.f32 %v375_v5, 0.0  ;;  %v370_v8 = vadd.f32 %v573_v39, %v971_v26 }
 0x1a5   :  { %v713_v27 = vpop.f32.mrf.mxu1 }
 0x1a6   :  { %v385_v1 = vadd.f32 %v713_v27, %v573_v39  ;;  %v448_v9 = vmax.f32 %v370_v8, 0.0 }
 0x1a7   :  { %v973_v28 = vpop.f32.mrf.mxu1 }
 0x1a8   :  { %v451_v3 = vmax.f32 %v385_v1, 0.0  ;;  %v380_v4 = vadd.f32 %v573_v39, %v973_v28 }
 0x1a9   :  { %v716_v29 = vpop.f32.mrf.mxu1 }
 0x1aa   :  { %v395_v61 = vadd.f32 %v716_v29, %v573_v39  ;;  %v450_v6 = vmax.f32 %v380_v4, 0.0 }
 0x1ab   :  { %v389_v30 = vpop.f32.mrf.mxu1 }
 0x1ac   :  { %v453_v63 = vmax.f32 %v395_v61, 0.0  ;;  %v390_v0 = vadd.f32 %v573_v39, %v389_v30 }
 0x1ad   :  { %v719_v31 = vpop.f32.mrf.mxu1 }
 0x1ae   :  { %v405_v57 = vadd.f32 %v719_v31, %v573_v39  ;;  %v452_v2 = vmax.f32 %v390_v0, 0.0 }
 0x1af   :  { %v399_v32 = vpop.f32.mrf.mxu1 }
 0x1b0   :  { %v455_v59 = vmax.f32 %v405_v57, 0.0  ;;  %v400_v60 = vadd.f32 %v573_v39, %v399_v32 }
 0x1b1   :  { %v722_v33 = vpop.f32.mrf.mxu1 }
 0x1b2   :  { %v415_v53 = vadd.f32 %v722_v33, %v573_v39  ;;  %v454_v62 = vmax.f32 %v400_v60, 0.0 }
 0x1b3   :  { %v409_v34 = vpop.f32.mrf.mxu1 }
 0x1b4   :  { %v457_v55 = vmax.f32 %v415_v53, 0.0  ;;  %v410_v56 = vadd.f32 %v573_v39, %v409_v34 }
 0x1b5   :  { %v725_v35 = vpop.f32.mrf.mxu1 }
 0x1b6   :  { %v425_v49 = vadd.f32 %v725_v35, %v573_v39  ;;  %v456_v58 = vmax.f32 %v410_v56, 0.0 }
 0x1b7   :  { %v419_v36 = vpop.f32.mrf.mxu1 }
 0x1b8   :  { %v459_v51 = vmax.f32 %v425_v49, 0.0  ;;  %v420_v52 = vadd.f32 %v573_v39, %v419_v36 }
 0x1b9   :  { %v728_v37 = vpop.f32.mrf.mxu1 }
 0x1ba   :  { %v435_v45 = vadd.f32 %v728_v37, %v573_v39  ;;  %v458_v54 = vmax.f32 %v420_v52, 0.0 }
 0x1bb   :  { %v429_v38 = vpop.f32.mrf.mxu1 }
 0x1bc   :  { %v461_v47 = vmax.f32 %v435_v45, 0.0  ;;  %v430_v48 = vadd.f32 %v573_v39, %v429_v38 }
 0x1bd   :  { %v731_v40 = vpop.f32.mrf.mxu1 }
 0x1be   :  { %v445_v41 = vadd.f32 %v731_v40, %v573_v39  ;;  %v460_v50 = vmax.f32 %v430_v48, 0.0 }
 0x1bf   :  { %v439_v42 = vpop.f32.mrf.mxu1 }
 0x1c0   :  { %v463_v43 = vmax.f32 %v445_v41, 0.0  ;;  %v440_v44 = vadd.f32 %v573_v39, %v439_v42 }
 0x1c2   :  { %733 = vmatpush3.xpose.msra.mxu0 %v463_v43  ;;  %v462_v46 = vmax.f32 %v440_v44, 0.0 }
 0x1c3   :  { %734 = vmatprep.subr.mxu0 %v803_v22 }
 0x1c6   :  { %735 = vmatpush3.xpose.msra.mxu0 %v462_v46 }
 0x1c7   :  { %736 = vmatprep.subr.mxu0 %v803_v22 }
 0x1ca   :  { %737 = vmatpush3.xpose.msra.mxu0 %v461_v47 }
 0x1cb   :  { %738 = vmatprep.subr.mxu0 %v803_v22 }
 0x1ce   :  { %739 = vmatpush3.xpose.msra.mxu0 %v460_v50 }
 0x1cf   :  { %740 = vmatprep.subr.mxu0 %v803_v22 }
 0x1d2   :  { %741 = vmatpush3.xpose.msra.mxu0 %v459_v51 }
 0x1d3   :  { %742 = vmatprep.subr.mxu0 %v803_v22 }
 0x1d6   :  { %743 = vmatpush3.xpose.msra.mxu0 %v458_v54 }
 0x1d7   :  { %744 = vmatprep.subr.mxu0 %v803_v22 }
 0x1da   :  { %745 = vmatpush3.xpose.msra.mxu0 %v457_v55 }
 0x1db   :  { %746 = vmatprep.subr.mxu0 %v803_v22 }
 0x1de   :  { %747 = vmatpush3.xpose.msra.mxu0 %v456_v58 }
 0x1df   :  { %748 = vmatprep.subr.mxu0 %v803_v22 }
 0x1e2   :  { %749 = vmatpush3.xpose.msra.mxu0 %v455_v59 }
 0x1e3   :  { %750 = vmatprep.subr.mxu0 %v803_v22 }
 0x1e6   :  { %751 = vmatpush3.xpose.msra.mxu0 %v454_v62 }
 0x1e7   :  { %752 = vmatprep.subr.mxu0 %v803_v22 }
 0x1ea   :  { %753 = vmatpush3.xpose.msra.mxu0 %v453_v63 }
 0x1eb   :  { %754 = vmatprep.subr.mxu0 %v803_v22 }
 0x1ee   :  { %755 = vmatpush3.xpose.msra.mxu0 %v452_v2 }
 0x1ef   :  { %756 = vmatprep.subr.mxu0 %v803_v22 }
 0x1f2   :  { %757 = vmatpush3.xpose.msra.mxu0 %v451_v3 }
 0x1f3   :  { %758 = vmatprep.subr.mxu0 %v803_v22 }
 0x1f6   :  { %759 = vmatpush3.xpose.msra.mxu0 %v450_v6 }
 0x1f7   :  { %760 = vmatprep.subr.mxu0 %v803_v22 }
 0x1fa   :  { %761 = vmatpush3.xpose.msra.mxu0 %v449_v7 }
 0x1fb   :  { %762 = vmatprep.subr.mxu0 %v803_v22 }
 0x1fe   :  { %763 = vmatpush3.xpose.msra.mxu0 %v448_v9 }
 0x201   :  { %765 = vmatmul.mubr.f32.vlgmr.msra.gmra.mxu0 %v78_v10 }
 0x2c1   :  { %v540_v16 = vpop.f32.mrf.mxu0 }
 0x2c2   :  { %v541_v17 = vadd.f32 %v540_v16, %v473_v15 }
 0x2c3   :  { %v766_v18 = vpop.f32.mrf.mxu0 }
 0x2c4   :  { %v574_v19 = vmul.f32 -1.442695, %v541_v17 }
 0x2c6   :  { %774 = vpow2.f32 %v574_v19 }
 0x2d3   :  { %v775_v20 = vpop.eup %774 }
 0x2d4   :  { %v547_v21 = vadd.f32 1.0, %v775_v20 }
 0x2d6   :  { %776 = vrcp.f32 %v547_v21 }
 0x2e3   :  { %v777_v22 = vpop.eup %776 }
 0x2e4   :  { %550 = vst [vmem:[%s1009_s7] sm:$0x1] %v777_v22 }
 0x2e5   :  { %555 = vsyncpa [#allocation4], 1 }

</bundles_post_ra>
